<compile_context>
chip_gen: v5e
topology: v5e:2x2
jax: 0.10.0
libtpu: 0.0.40
codegen_flags: <defaults>
</compile_context>

<pallas_src>
import functools

import jax
import jax.numpy as jnp
from jax.experimental import pallas as pl
from jax.experimental.pallas import tpu as pltpu


# ---------------- fused per-k forward kernel ----------------

def fused_forward_kernel(bk_ref, bkt_ref, gum_ref, a_ref, x_ref,
                         w1s_ref, w1n_ref, b1_ref, w2s_ref, w2n_ref, b2_ref,
                         oh_ref, loss_ref, logp_ref, *, num_sample):
    n = a_ref.shape[0]
    bk = bk_ref[...]          # (n, n)  B[k]
    bkt = bkt_ref[...]        # (n, n)  B[k]^T  (so no in-kernel transpose is needed)
    a = a_ref[...]            # (n, n)  dense adjacency A

    # logsumexp(Bk, dim=0) as a COLUMN vector: lse_col[m] = logsumexp_r Bk[r, m]
    cmax = jnp.max(bkt, axis=1, keepdims=True)                          # (n, 1)
    lse_col = cmax + jnp.log(jnp.sum(jnp.exp(bkt - cmax), axis=1, keepdims=True))

    # Gumbel top-k sampling without replacement from each row i of P = softmax(Bk, 0).
    # Transposed scores: scores_t[m, i] = Bk[i, m] - lse[m] + G[i, m]
    scores_t = bkt - lse_col + gum_ref[...]                             # (n, n)

    row_ids = jax.lax.broadcasted_iota(jnp.int32, (n, n), 0).astype(jnp.float32)

    def select_one(_, carry):
        m_sel, rem = carry
        col_max = jnp.max(rem, axis=0, keepdims=True)                   # (1, n)
        is_max = rem >= col_max
        first = jnp.min(jnp.where(is_max, row_ids, jnp.float32(n)),
                        axis=0, keepdims=True)                          # tie-break
        sel = row_ids == first                                          # one per column
        return (m_sel + sel.astype(jnp.float32),
                jnp.where(sel, jnp.float32(-1e30), rem))

    m_sel, _ = jax.lax.fori_loop(
        0, num_sample, select_one,
        (jnp.zeros((n, n), jnp.float32), scores_t), unroll=True)
    # m_sel[r, i] == 1  iff  r == S[i, j] for some j   (the torch M)

    # g[i] = sum_j Bk[S[i,j], i]  (samples are w/o replacement -> column sums of M⊙Bk)
    g = jnp.sum(m_sel * bk, axis=0, keepdims=True)                      # (1, n)
    logp_ref[...] = (jnp.sum(g, axis=1, keepdims=True)
                     - jnp.sum(lse_col, axis=0, keepdims=True))         # (1, 1)

    # edited adjacency: C = A + M * (A_c - A) = A + M * (1 - 2A)
    c_adj = a + m_sel * (1.0 - 2.0 * a)

    # TODO(synk): SAGE / GPRGNN class bodies are not provided in the source module;
    # this is a 2-layer mean-aggregation GraphSAGE stand-in on the dense adjacency C
    # (dense_to_sparse -> edge_index -> GNN is equivalent to using C directly).
    deg = jnp.sum(c_adj, axis=1, keepdims=True)
    c_norm = c_adj * pl.reciprocal(jnp.maximum(deg, 1.0), approx=True)  # fold 1/deg

    x = x_ref[...]                                                      # (n, d)
    neigh1 = jnp.dot(c_norm, x, preferred_element_type=jnp.float32)
    h = (jnp.dot(x, w1s_ref[...], preferred_element_type=jnp.float32)
         + jnp.dot(neigh1, w1n_ref[...], preferred_element_type=jnp.float32)
         + b1_ref[...])
    h = jnp.maximum(h, 0.0)

    neigh2 = jnp.dot(c_norm, h, preferred_element_type=jnp.float32)
    out = (jnp.dot(h, w2s_ref[...], preferred_element_type=jnp.float32)
           + jnp.dot(neigh2, w2n_ref[...], preferred_element_type=jnp.float32)
           + b2_ref[...])                                               # (n, c)

    # cross entropy with mean reduction (log_softmax + NLL)
    oh = oh_ref[...]                                                    # (n, c)
    rmax = jnp.max(out, axis=1, keepdims=True)
    row_lse = rmax + jnp.log(jnp.sum(jnp.exp(out - rmax), axis=1, keepdims=True))
    picked = jnp.sum(oh * out, axis=1, keepdims=True)
    loss_ref[...] = jnp.sum(row_lse - picked, axis=0, keepdims=True) / jnp.float32(n)


def fused_forward(B, Bt, gumbel_t, A, x, w1s, w1n, b1, w2s, w2n, b2, onehot,
                  *, num_sample):
    K, n, _ = B.shape
    d = x.shape[1]
    hidden = w1s.shape[1]
    c = w2s.shape[1]

    per_k3 = lambda k: (k, 0, 0)
    fixed2 = lambda k: (0, 0)

    in_specs = [
        pl.BlockSpec((None, n, n), per_k3),   # B[k]
        pl.BlockSpec((None, n, n), per_k3),   # B[k]^T
        pl.BlockSpec((None, n, n), per_k3),   # gumbel noise for step k
        pl.BlockSpec((n, n), fixed2),         # A (shared, stays VMEM-resident)
        pl.BlockSpec((n, d), fixed2),         # x
        pl.BlockSpec((d, hidden), fixed2),    # W1_self
        pl.BlockSpec((d, hidden), fixed2),    # W1_neigh
        pl.BlockSpec((1, hidden), fixed2),    # b1
        pl.BlockSpec((hidden, c), fixed2),    # W2_self
        pl.BlockSpec((hidden, c), fixed2),    # W2_neigh
        pl.BlockSpec((1, c), fixed2),         # b2
        pl.BlockSpec((n, c), fixed2),         # one-hot labels
    ]
    out_specs = (pl.BlockSpec((None, 1, 1), per_k3),    # loss[k]
                 pl.BlockSpec((None, 1, 1), per_k3))    # log_p[k]
    out_shape = (jax.ShapeDtypeStruct((K, 1, 1), jnp.float32),
                 jax.ShapeDtypeStruct((K, 1, 1), jnp.float32))

    return pl.pallas_call(
        functools.partial(fused_forward_kernel, num_sample=num_sample),
        grid=(K,),
        in_specs=in_specs,
        out_specs=out_specs,
        out_shape=out_shape,
        compiler_params=pltpu.CompilerParams(dimension_semantics=("parallel",)),
    )(B, Bt, gumbel_t, A, x, w1s, w1n, b1, w2s, w2n, b2, onehot)


# ---------------- Model forward (glue in JAX) ----------------

def model_forward(params, x, y, edge_index, n, K, num_sample, num_classes, key):
    # to_dense_adj
    A = jnp.zeros((n, n), jnp.float32).at[edge_index[0], edge_index[1]].set(1.0)
    onehot = jax.nn.one_hot(y[:, 0], num_classes, dtype=jnp.float32)

    B = params["B"]                        # (K, n, n)
    Bt = jnp.swapaxes(B, 1, 2)             # per-k transpose done once, outside kernel
    # TODO(synk): torch.multinomial's RNG stream cannot be reproduced; Gumbel top-k
    # (without replacement) sampling is used instead, so the random draws differ.
    gumbel_t = jax.random.gumbel(key, (K, n, n), dtype=jnp.float32)

    loss_k, logp_k = fused_forward(
        B, Bt, gumbel_t, A, x,
        params["W1_self"], params["W1_neigh"], params["b1"],
        params["W2_self"], params["W2_neigh"], params["b2"],
        onehot, num_sample=num_sample)

    Loss = loss_k[:, 0, 0]                                  # (K,)
    Mean = jnp.mean(Loss)
    denom = max(K - 1, 1)                                   # torch.var_mean (unbiased); guard K==1
    Var = jnp.sum((Loss - Mean) ** 2) / denom
    Log_p = jnp.sum(logp_k)
    return Var, Mean, Log_p


if __name__ == "__main__":
    n, d, hidden, c = 16, 8, 32, 4
    K, num_sample = 2, 4

    key = jax.random.PRNGKey(0)
    k_b, k_w1, k_w2, k_w3, k_w4, k_x, k_y, k_e, k_s = jax.random.split(key, 9)

    params = {
        # Graph_Editer.B : (K, n, n), uniform init (reset_parameters)
        "B": jax.random.uniform(k_b, (K, n, n), jnp.float32),
        # SAGE stand-in weights
        "W1_self": 0.1 * jax.random.normal(k_w1, (d, hidden), jnp.float32),
        "W1_neigh": 0.1 * jax.random.normal(k_w2, (d, hidden), jnp.float32),
        "b1": jnp.zeros((1, hidden), jnp.float32),
        "W2_self": 0.1 * jax.random.normal(k_w3, (hidden, c), jnp.float32),
        "W2_neigh": 0.1 * jax.random.normal(k_w4, (hidden, c), jnp.float32),
        "b2": jnp.zeros((1, c), jnp.float32),
    }

    x = jax.random.normal(k_x, (n, d), jnp.float32)          # node_feat
    y = jax.random.randint(k_y, (n, 1), 0, c)                # labels
    num_edges = 40
    src = jax.random.randint(k_e, (num_edges,), 0, n)
    dst = jax.random.randint(jax.random.fold_in(k_e, 1), (num_edges,), 0, n)
    edge_index = jnp.stack([src, dst])                       # (2, E)

    Var, Mean, Log_p = model_forward(params, x, y, edge_index, n, K, num_sample, c, k_s)
    jax.block_until_ready((Var, Mean, Log_p))
    print("KERNEL_OK")
</pallas_src>

<mosaic_0001>
module attributes {stable_mosaic.version = 11 : i64} {
  func.func @fused_forward_kernel(%arg0: i32, %arg1: memref<1x16x16xf32, #tpu.memory_space<vmem>>, %arg2: memref<1x16x16xf32, #tpu.memory_space<vmem>>, %arg3: memref<1x16x16xf32, #tpu.memory_space<vmem>>, %arg4: memref<16x16xf32, #tpu.memory_space<vmem>>, %arg5: memref<16x8xf32, #tpu.memory_space<vmem>>, %arg6: memref<8x32xf32, #tpu.memory_space<vmem>>, %arg7: memref<8x32xf32, #tpu.memory_space<vmem>>, %arg8: memref<1x32xf32, #tpu.memory_space<vmem>>, %arg9: memref<32x4xf32, #tpu.memory_space<vmem>>, %arg10: memref<32x4xf32, #tpu.memory_space<vmem>>, %arg11: memref<1x4xf32, #tpu.memory_space<vmem>>, %arg12: memref<16x4xf32, #tpu.memory_space<vmem>>, %arg13: memref<1x1x1xf32, #tpu.memory_space<vmem>>, %arg14: memref<1x1x1xf32, #tpu.memory_space<vmem>>) attributes {dimension_semantics = [#tpu.dimension_semantics<parallel>], iteration_bounds = array<i64: 2>, scalar_prefetch = 0 : i64, scratch_operands = 0 : i64, tpu.core_type = #tpu.core_type<tc>, window_params = [{transform_indices = @transform_0, window_bounds = array<i64: 1, 16, 16>}, {transform_indices = @transform_1, window_bounds = array<i64: 1, 16, 16>}, {transform_indices = @transform_2, window_bounds = array<i64: 1, 16, 16>}, {pipeline_mode = #tpu.pipeline_mode<synchronous>, transform_indices = @transform_3, window_bounds = array<i64: 16, 16>}, {pipeline_mode = #tpu.pipeline_mode<synchronous>, transform_indices = @transform_4, window_bounds = array<i64: 16, 8>}, {pipeline_mode = #tpu.pipeline_mode<synchronous>, transform_indices = @transform_5, window_bounds = array<i64: 8, 32>}, {pipeline_mode = #tpu.pipeline_mode<synchronous>, transform_indices = @transform_6, window_bounds = array<i64: 8, 32>}, {pipeline_mode = #tpu.pipeline_mode<synchronous>, transform_indices = @transform_7, window_bounds = array<i64: 1, 32>}, {pipeline_mode = #tpu.pipeline_mode<synchronous>, transform_indices = @transform_8, window_bounds = array<i64: 32, 4>}, {pipeline_mode = #tpu.pipeline_mode<synchronous>, transform_indices = @transform_9, window_bounds = array<i64: 32, 4>}, {pipeline_mode = #tpu.pipeline_mode<synchronous>, transform_indices = @transform_10, window_bounds = array<i64: 1, 4>}, {pipeline_mode = #tpu.pipeline_mode<synchronous>, transform_indices = @transform_11, window_bounds = array<i64: 16, 4>}, {transform_indices = @transform_12, window_bounds = array<i64: 1, 1, 1>}, {transform_indices = @transform_13, window_bounds = array<i64: 1, 1, 1>}]} {
    %c0 = arith.constant 0 : index
    %c0_0 = arith.constant 0 : index
    %c0_1 = arith.constant 0 : index
    %0 = vector.load %arg1[%c0, %c0_0, %c0_1] : memref<1x16x16xf32, #tpu.memory_space<vmem>>, vector<1x16x16xf32>
    %1 = vector.shape_cast %0 : vector<1x16x16xf32> to vector<16x16xf32>
    %c0_2 = arith.constant 0 : index
    %c0_3 = arith.constant 0 : index
    %c0_4 = arith.constant 0 : index
    %2 = vector.load %arg2[%c0_2, %c0_3, %c0_4] : memref<1x16x16xf32, #tpu.memory_space<vmem>>, vector<1x16x16xf32>
    %3 = vector.shape_cast %2 : vector<1x16x16xf32> to vector<16x16xf32>
    %c0_5 = arith.constant 0 : index
    %c0_6 = arith.constant 0 : index
    %4 = vector.load %arg4[%c0_5, %c0_6] : memref<16x16xf32, #tpu.memory_space<vmem>>, vector<16x16xf32>
    %cst = arith.constant dense<0xFF800000> : vector<16xf32>
    %5 = vector.multi_reduction <maximumf>, %3, %cst [1] : vector<16x16xf32> to vector<16xf32>
    %6 = vector.shape_cast %5 : vector<16xf32> to vector<16x1xf32>
    %7 = vector.broadcast %6 : vector<16x1xf32> to vector<16x16xf32>
    %8 = arith.subf %3, %7 : vector<16x16xf32>
    %9 = math.exp %8 : vector<16x16xf32>
    %cst_7 = arith.constant dense<0.000000e+00> : vector<16xf32>
    %10 = vector.multi_reduction <add>, %9, %cst_7 [1] : vector<16x16xf32> to vector<16xf32>
    %11 = vector.shape_cast %10 : vector<16xf32> to vector<16x1xf32>
    %12 = math.log %11 : vector<16x1xf32>
    %13 = arith.addf %6, %12 : vector<16x1xf32>
    %14 = vector.broadcast %13 : vector<16x1xf32> to vector<16x16xf32>
    %15 = arith.subf %3, %14 : vector<16x16xf32>
    %c0_8 = arith.constant 0 : index
    %c0_9 = arith.constant 0 : index
    %c0_10 = arith.constant 0 : index
    %16 = vector.load %arg3[%c0_8, %c0_9, %c0_10] : memref<1x16x16xf32, #tpu.memory_space<vmem>>, vector<1x16x16xf32>
    %17 = vector.shape_cast %16 : vector<1x16x16xf32> to vector<16x16xf32>
    %18 = arith.addf %15, %17 : vector<16x16xf32>
    %19 = tpu.iota {dimensions = array<i32: 0>} : vector<16x16xi32>
    %20 = arith.sitofp %19 : vector<16x16xi32> to vector<16x16xf32>
    %cst_11 = arith.constant 0.000000e+00 : f32
    %21 = vector.broadcast %cst_11 : f32 to vector<16x16xf32>
    %c0_i32 = arith.constant 0 : i32
    %cst_12 = arith.constant dense<0xFF800000> : vector<16xf32>
    %22 = vector.multi_reduction <maximumf>, %18, %cst_12 [0] : vector<16x16xf32> to vector<16xf32>
    %23 = vector.shape_cast %22 : vector<16xf32> to vector<1x16xf32>
    %24 = vector.broadcast %23 : vector<1x16xf32> to vector<16x16xf32>
    %25 = arith.cmpf oge, %18, %24 : vector<16x16xf32>
    %cst_13 = arith.constant 1.600000e+01 : f32
    %26 = vector.broadcast %cst_13 : f32 to vector<16x16xf32>
    %27 = arith.select %25, %20, %26 : vector<16x16xi1>, vector<16x16xf32>
    %cst_14 = arith.constant dense<0x7F800000> : vector<16xf32>
    %28 = vector.multi_reduction <minimumf>, %27, %cst_14 [0] : vector<16x16xf32> to vector<16xf32>
    %29 = vector.shape_cast %28 : vector<16xf32> to vector<1x16xf32>
    %30 = vector.broadcast %29 : vector<1x16xf32> to vector<16x16xf32>
    %31 = arith.cmpf oeq, %20, %30 : vector<16x16xf32>
    %32 = arith.extui %31 : vector<16x16xi1> to vector<16x16xi32>
    %33 = arith.sitofp %32 : vector<16x16xi32> to vector<16x16xf32>
    %34 = arith.addf %21, %33 : vector<16x16xf32>
    %cst_15 = arith.constant -1.000000e+30 : f32
    %35 = vector.broadcast %cst_15 : f32 to vector<16x16xf32>
    %36 = arith.select %31, %35, %18 : vector<16x16xi1>, vector<16x16xf32>
    %c1_i32 = arith.constant 1 : i32
    %cst_16 = arith.constant dense<0xFF800000> : vector<16xf32>
    %37 = vector.multi_reduction <maximumf>, %36, %cst_16 [0] : vector<16x16xf32> to vector<16xf32>
    %38 = vector.shape_cast %37 : vector<16xf32> to vector<1x16xf32>
    %39 = vector.broadcast %38 : vector<1x16xf32> to vector<16x16xf32>
    %40 = arith.cmpf oge, %36, %39 : vector<16x16xf32>
    %cst_17 = arith.constant 1.600000e+01 : f32
    %41 = vector.broadcast %cst_17 : f32 to vector<16x16xf32>
    %42 = arith.select %40, %20, %41 : vector<16x16xi1>, vector<16x16xf32>
    %cst_18 = arith.constant dense<0x7F800000> : vector<16xf32>
    %43 = vector.multi_reduction <minimumf>, %42, %cst_18 [0] : vector<16x16xf32> to vector<16xf32>
    %44 = vector.shape_cast %43 : vector<16xf32> to vector<1x16xf32>
    %45 = vector.broadcast %44 : vector<1x16xf32> to vector<16x16xf32>
    %46 = arith.cmpf oeq, %20, %45 : vector<16x16xf32>
    %47 = arith.extui %46 : vector<16x16xi1> to vector<16x16xi32>
    %48 = arith.sitofp %47 : vector<16x16xi32> to vector<16x16xf32>
    %49 = arith.addf %34, %48 : vector<16x16xf32>
    %cst_19 = arith.constant -1.000000e+30 : f32
    %50 = vector.broadcast %cst_19 : f32 to vector<16x16xf32>
    %51 = arith.select %46, %50, %36 : vector<16x16xi1>, vector<16x16xf32>
    %c2_i32 = arith.constant 2 : i32
    %cst_20 = arith.constant dense<0xFF800000> : vector<16xf32>
    %52 = vector.multi_reduction <maximumf>, %51, %cst_20 [0] : vector<16x16xf32> to vector<16xf32>
    %53 = vector.shape_cast %52 : vector<16xf32> to vector<1x16xf32>
    %54 = vector.broadcast %53 : vector<1x16xf32> to vector<16x16xf32>
    %55 = arith.cmpf oge, %51, %54 : vector<16x16xf32>
    %cst_21 = arith.constant 1.600000e+01 : f32
    %56 = vector.broadcast %cst_21 : f32 to vector<16x16xf32>
    %57 = arith.select %55, %20, %56 : vector<16x16xi1>, vector<16x16xf32>
    %cst_22 = arith.constant dense<0x7F800000> : vector<16xf32>
    %58 = vector.multi_reduction <minimumf>, %57, %cst_22 [0] : vector<16x16xf32> to vector<16xf32>
    %59 = vector.shape_cast %58 : vector<16xf32> to vector<1x16xf32>
    %60 = vector.broadcast %59 : vector<1x16xf32> to vector<16x16xf32>
    %61 = arith.cmpf oeq, %20, %60 : vector<16x16xf32>
    %62 = arith.extui %61 : vector<16x16xi1> to vector<16x16xi32>
    %63 = arith.sitofp %62 : vector<16x16xi32> to vector<16x16xf32>
    %64 = arith.addf %49, %63 : vector<16x16xf32>
    %cst_23 = arith.constant -1.000000e+30 : f32
    %65 = vector.broadcast %cst_23 : f32 to vector<16x16xf32>
    %66 = arith.select %61, %65, %51 : vector<16x16xi1>, vector<16x16xf32>
    %c3_i32 = arith.constant 3 : i32
    %cst_24 = arith.constant dense<0xFF800000> : vector<16xf32>
    %67 = vector.multi_reduction <maximumf>, %66, %cst_24 [0] : vector<16x16xf32> to vector<16xf32>
    %68 = vector.shape_cast %67 : vector<16xf32> to vector<1x16xf32>
    %69 = vector.broadcast %68 : vector<1x16xf32> to vector<16x16xf32>
    %70 = arith.cmpf oge, %66, %69 : vector<16x16xf32>
    %cst_25 = arith.constant 1.600000e+01 : f32
    %71 = vector.broadcast %cst_25 : f32 to vector<16x16xf32>
    %72 = arith.select %70, %20, %71 : vector<16x16xi1>, vector<16x16xf32>
    %cst_26 = arith.constant dense<0x7F800000> : vector<16xf32>
    %73 = vector.multi_reduction <minimumf>, %72, %cst_26 [0] : vector<16x16xf32> to vector<16xf32>
    %74 = vector.shape_cast %73 : vector<16xf32> to vector<1x16xf32>
    %75 = vector.broadcast %74 : vector<1x16xf32> to vector<16x16xf32>
    %76 = arith.cmpf oeq, %20, %75 : vector<16x16xf32>
    %77 = arith.extui %76 : vector<16x16xi1> to vector<16x16xi32>
    %78 = arith.sitofp %77 : vector<16x16xi32> to vector<16x16xf32>
    %79 = arith.addf %64, %78 : vector<16x16xf32>
    %cst_27 = arith.constant -1.000000e+30 : f32
    %80 = vector.broadcast %cst_27 : f32 to vector<16x16xf32>
    %81 = arith.select %76, %80, %66 : vector<16x16xi1>, vector<16x16xf32>
    %82 = arith.mulf %79, %1 : vector<16x16xf32>
    %cst_28 = arith.constant dense<0.000000e+00> : vector<16xf32>
    %83 = vector.multi_reduction <add>, %82, %cst_28 [0] : vector<16x16xf32> to vector<16xf32>
    %84 = vector.shape_cast %83 : vector<16xf32> to vector<1x16xf32>
    %cst_29 = arith.constant dense<0.000000e+00> : vector<1xf32>
    %85 = vector.multi_reduction <add>, %84, %cst_29 [1] : vector<1x16xf32> to vector<1xf32>
    %86 = vector.shape_cast %85 : vector<1xf32> to vector<1x1xf32>
    %cst_30 = arith.constant dense<0.000000e+00> : vector<1xf32>
    %87 = vector.multi_reduction <add>, %13, %cst_30 [0] : vector<16x1xf32> to vector<1xf32>
    %88 = vector.shape_cast %87 : vector<1xf32> to vector<1x1xf32>
    %89 = arith.subf %86, %88 : vector<1x1xf32>
    %c0_31 = arith.constant 0 : index
    %c0_32 = arith.constant 0 : index
    %c0_33 = arith.constant 0 : index
    %90 = vector.load %arg14[%c0_31, %c0_32, %c0_33] : memref<1x1x1xf32, #tpu.memory_space<vmem>>, vector<1x1x1xf32>
    %91 = vector.shape_cast %90 : vector<1x1x1xf32> to vector<1x1xf32>
    %92 = vector.shape_cast %89 : vector<1x1xf32> to vector<1x1x1xf32>
    tpu.vector_store %arg14[%c0_31, %c0_32, %c0_33], %92 {strides = array<i32>} : memref<1x1x1xf32, #tpu.memory_space<vmem>>, vector<1x1x1xf32>,
    %cst_34 = arith.constant 2.000000e+00 : f32
    %93 = vector.broadcast %cst_34 : f32 to vector<16x16xf32>
    %94 = arith.mulf %93, %4 : vector<16x16xf32>
    %cst_35 = arith.constant 1.000000e+00 : f32
    %95 = vector.broadcast %cst_35 : f32 to vector<16x16xf32>
    %96 = arith.subf %95, %94 : vector<16x16xf32>
    %97 = arith.mulf %79, %96 : vector<16x16xf32>
    %98 = arith.addf %4, %97 : vector<16x16xf32>
    %cst_36 = arith.constant dense<0.000000e+00> : vector<16xf32>
    %99 = vector.multi_reduction <add>, %98, %cst_36 [1] : vector<16x16xf32> to vector<16xf32>
    %100 = vector.shape_cast %99 : vector<16xf32> to vector<16x1xf32>
    %cst_37 = arith.constant 1.000000e+00 : f32
    %101 = vector.broadcast %cst_37 : f32 to vector<16x1xf32>
    %102 = arith.maximumf %100, %101 : vector<16x1xf32>
    %103 = tpu.reciprocal %102 {approx = true} : vector<16x1xf32> -> vector<16x1xf32>
    %104 = vector.broadcast %103 : vector<16x1xf32> to vector<16x16xf32>
    %105 = arith.mulf %98, %104 : vector<16x16xf32>
    %c0_38 = arith.constant 0 : index
    %c0_39 = arith.constant 0 : index
    %106 = vector.load %arg5[%c0_38, %c0_39] : memref<16x8xf32, #tpu.memory_space<vmem>>, vector<16x8xf32>
    %cst_40 = arith.constant dense<0.000000e+00> : vector<16x8xf32>
    %107 = tpu.matmul %105, %106, %cst_40 {dimension_numbers = #tpu.dot_dimension_numbers<[1], [0], [0], [1], [0, 0, 1, 1], [], []>} : vector<16x16xf32>, vector<16x8xf32>, vector<16x8xf32> -> vector<16x8xf32>
    %c0_41 = arith.constant 0 : index
    %c0_42 = arith.constant 0 : index
    %108 = vector.load %arg6[%c0_41, %c0_42] : memref<8x32xf32, #tpu.memory_space<vmem>>, vector<8x32xf32>
    %cst_43 = arith.constant dense<0.000000e+00> : vector<16x32xf32>
    %109 = tpu.matmul %106, %108, %cst_43 {dimension_numbers = #tpu.dot_dimension_numbers<[1], [0], [0], [1], [0, 0, 1, 1], [], []>} : vector<16x8xf32>, vector<8x32xf32>, vector<16x32xf32> -> vector<16x32xf32>
    %c0_44 = arith.constant 0 : index
    %c0_45 = arith.constant 0 : index
    %110 = vector.load %arg7[%c0_44, %c0_45] : memref<8x32xf32, #tpu.memory_space<vmem>>, vector<8x32xf32>
    %cst_46 = arith.constant dense<0.000000e+00> : vector<16x32xf32>
    %111 = tpu.matmul %107, %110, %cst_46 {dimension_numbers = #tpu.dot_dimension_numbers<[1], [0], [0], [1], [0, 0, 1, 1], [], []>} : vector<16x8xf32>, vector<8x32xf32>, vector<16x32xf32> -> vector<16x32xf32>
    %112 = arith.addf %109, %111 : vector<16x32xf32>
    %c0_47 = arith.constant 0 : index
    %c0_48 = arith.constant 0 : index
    %113 = vector.load %arg8[%c0_47, %c0_48] : memref<1x32xf32, #tpu.memory_space<vmem>>, vector<1x32xf32>
    %114 = vector.broadcast %113 : vector<1x32xf32> to vector<16x32xf32>
    %115 = arith.addf %112, %114 : vector<16x32xf32>
    %cst_49 = arith.constant 0.000000e+00 : f32
    %116 = vector.broadcast %cst_49 : f32 to vector<16x32xf32>
    %117 = arith.maximumf %115, %116 : vector<16x32xf32>
    %cst_50 = arith.constant dense<0.000000e+00> : vector<16x32xf32>
    %118 = tpu.matmul %105, %117, %cst_50 {dimension_numbers = #tpu.dot_dimension_numbers<[1], [0], [0], [1], [0, 0, 1, 1], [], []>} : vector<16x16xf32>, vector<16x32xf32>, vector<16x32xf32> -> vector<16x32xf32>
    %c0_51 = arith.constant 0 : index
    %c0_52 = arith.constant 0 : index
    %119 = vector.load %arg9[%c0_51, %c0_52] : memref<32x4xf32, #tpu.memory_space<vmem>>, vector<32x4xf32>
    %cst_53 = arith.constant dense<0.000000e+00> : vector<16x4xf32>
    %120 = tpu.matmul %117, %119, %cst_53 {dimension_numbers = #tpu.dot_dimension_numbers<[1], [0], [0], [1], [0, 0, 1, 1], [], []>} : vector<16x32xf32>, vector<32x4xf32>, vector<16x4xf32> -> vector<16x4xf32>
    %c0_54 = arith.constant 0 : index
    %c0_55 = arith.constant 0 : index
    %121 = vector.load %arg10[%c0_54, %c0_55] : memref<32x4xf32, #tpu.memory_space<vmem>>, vector<32x4xf32>
    %cst_56 = arith.constant dense<0.000000e+00> : vector<16x4xf32>
    %122 = tpu.matmul %118, %121, %cst_56 {dimension_numbers = #tpu.dot_dimension_numbers<[1], [0], [0], [1], [0, 0, 1, 1], [], []>} : vector<16x32xf32>, vector<32x4xf32>, vector<16x4xf32> -> vector<16x4xf32>
    %123 = arith.addf %120, %122 : vector<16x4xf32>
    %c0_57 = arith.constant 0 : index
    %c0_58 = arith.constant 0 : index
    %124 = vector.load %arg11[%c0_57, %c0_58] : memref<1x4xf32, #tpu.memory_space<vmem>>, vector<1x4xf32>
    %125 = vector.broadcast %124 : vector<1x4xf32> to vector<16x4xf32>
    %126 = arith.addf %123, %125 : vector<16x4xf32>
    %c0_59 = arith.constant 0 : index
    %c0_60 = arith.constant 0 : index
    %127 = vector.load %arg12[%c0_59, %c0_60] : memref<16x4xf32, #tpu.memory_space<vmem>>, vector<16x4xf32>
    %cst_61 = arith.constant dense<0xFF800000> : vector<16xf32>
    %128 = vector.multi_reduction <maximumf>, %126, %cst_61 [1] : vector<16x4xf32> to vector<16xf32>
    %129 = vector.shape_cast %128 : vector<16xf32> to vector<16x1xf32>
    %130 = vector.broadcast %129 : vector<16x1xf32> to vector<16x4xf32>
    %131 = arith.subf %126, %130 : vector<16x4xf32>
    %132 = math.exp %131 : vector<16x4xf32>
    %cst_62 = arith.constant dense<0.000000e+00> : vector<16xf32>
    %133 = vector.multi_reduction <add>, %132, %cst_62 [1] : vector<16x4xf32> to vector<16xf32>
    %134 = vector.shape_cast %133 : vector<16xf32> to vector<16x1xf32>
    %135 = math.log %134 : vector<16x1xf32>
    %136 = arith.addf %129, %135 : vector<16x1xf32>
    %137 = arith.mulf %127, %126 : vector<16x4xf32>
    %cst_63 = arith.constant dense<0.000000e+00> : vector<16xf32>
    %138 = vector.multi_reduction <add>, %137, %cst_63 [1] : vector<16x4xf32> to vector<16xf32>
    %139 = vector.shape_cast %138 : vector<16xf32> to vector<16x1xf32>
    %140 = arith.subf %136, %139 : vector<16x1xf32>
    %cst_64 = arith.constant dense<0.000000e+00> : vector<1xf32>
    %141 = vector.multi_reduction <add>, %140, %cst_64 [0] : vector<16x1xf32> to vector<1xf32>
    %142 = vector.shape_cast %141 : vector<1xf32> to vector<1x1xf32>
    %cst_65 = arith.constant 1.600000e+01 : f32
    %143 = vector.broadcast %cst_65 : f32 to vector<1x1xf32>
    %144 = arith.divf %142, %143 : vector<1x1xf32>
    %c0_66 = arith.constant 0 : index
    %c0_67 = arith.constant 0 : index
    %c0_68 = arith.constant 0 : index
    %145 = vector.load %arg13[%c0_66, %c0_67, %c0_68] : memref<1x1x1xf32, #tpu.memory_space<vmem>>, vector<1x1x1xf32>
    %146 = vector.shape_cast %145 : vector<1x1x1xf32> to vector<1x1xf32>
    %147 = vector.shape_cast %144 : vector<1x1xf32> to vector<1x1x1xf32>
    tpu.vector_store %arg13[%c0_66, %c0_67, %c0_68], %147 {strides = array<i32>} : memref<1x1x1xf32, #tpu.memory_space<vmem>>, vector<1x1x1xf32>,
    return
  }
  func.func @transform_0(%arg0: i32) -> (i32, i32, i32) {
    %c0_i32 = arith.constant 0 : i32
    %c0_i32_0 = arith.constant 0 : i32
    %c0_i32_1 = arith.constant 0 : i32
    return %arg0, %c0_i32, %c0_i32_0 : i32, i32, i32
  }
  func.func @transform_1(%arg0: i32) -> (i32, i32, i32) {
    %c0_i32 = arith.constant 0 : i32
    %c0_i32_0 = arith.constant 0 : i32
    %c0_i32_1 = arith.constant 0 : i32
    return %arg0, %c0_i32, %c0_i32_0 : i32, i32, i32
  }
  func.func @transform_2(%arg0: i32) -> (i32, i32, i32) {
    %c0_i32 = arith.constant 0 : i32
    %c0_i32_0 = arith.constant 0 : i32
    %c0_i32_1 = arith.constant 0 : i32
    return %arg0, %c0_i32, %c0_i32_0 : i32, i32, i32
  }
  func.func @transform_3(%arg0: i32) -> (i32, i32) {
    %c0_i32 = arith.constant 0 : i32
    %c0_i32_0 = arith.constant 0 : i32
    %c0_i32_1 = arith.constant 0 : i32
    return %c0_i32, %c0_i32_0 : i32, i32
  }
  func.func @transform_4(%arg0: i32) -> (i32, i32) {
    %c0_i32 = arith.constant 0 : i32
    %c0_i32_0 = arith.constant 0 : i32
    %c0_i32_1 = arith.constant 0 : i32
    return %c0_i32, %c0_i32_0 : i32, i32
  }
  func.func @transform_5(%arg0: i32) -> (i32, i32) {
    %c0_i32 = arith.constant 0 : i32
    %c0_i32_0 = arith.constant 0 : i32
    %c0_i32_1 = arith.constant 0 : i32
    return %c0_i32, %c0_i32_0 : i32, i32
  }
  func.func @transform_6(%arg0: i32) -> (i32, i32) {
    %c0_i32 = arith.constant 0 : i32
    %c0_i32_0 = arith.constant 0 : i32
    %c0_i32_1 = arith.constant 0 : i32
    return %c0_i32, %c0_i32_0 : i32, i32
  }
  func.func @transform_7(%arg0: i32) -> (i32, i32) {
    %c0_i32 = arith.constant 0 : i32
    %c0_i32_0 = arith.constant 0 : i32
    %c0_i32_1 = arith.constant 0 : i32
    return %c0_i32, %c0_i32_0 : i32, i32
  }
  func.func @transform_8(%arg0: i32) -> (i32, i32) {
    %c0_i32 = arith.constant 0 : i32
    %c0_i32_0 = arith.constant 0 : i32
    %c0_i32_1 = arith.constant 0 : i32
    return %c0_i32, %c0_i32_0 : i32, i32
  }
  func.func @transform_9(%arg0: i32) -> (i32, i32) {
    %c0_i32 = arith.constant 0 : i32
    %c0_i32_0 = arith.constant 0 : i32
    %c0_i32_1 = arith.constant 0 : i32
    return %c0_i32, %c0_i32_0 : i32, i32
  }
  func.func @transform_10(%arg0: i32) -> (i32, i32) {
    %c0_i32 = arith.constant 0 : i32
    %c0_i32_0 = arith.constant 0 : i32
    %c0_i32_1 = arith.constant 0 : i32
    return %c0_i32, %c0_i32_0 : i32, i32
  }
  func.func @transform_11(%arg0: i32) -> (i32, i32) {
    %c0_i32 = arith.constant 0 : i32
    %c0_i32_0 = arith.constant 0 : i32
    %c0_i32_1 = arith.constant 0 : i32
    return %c0_i32, %c0_i32_0 : i32, i32
  }
  func.func @transform_12(%arg0: i32) -> (i32, i32, i32) {
    %c0_i32 = arith.constant 0 : i32
    %c0_i32_0 = arith.constant 0 : i32
    %c0_i32_1 = arith.constant 0 : i32
    return %arg0, %c0_i32, %c0_i32_0 : i32, i32, i32
  }
  func.func @transform_13(%arg0: i32) -> (i32, i32, i32) {
    %c0_i32 = arith.constant 0 : i32
    %c0_i32_0 = arith.constant 0 : i32
    %c0_i32_1 = arith.constant 0 : i32
    return %arg0, %c0_i32, %c0_i32_0 : i32, i32, i32
  }
}

</mosaic_0001>

<bundles_post_ra>
// kernel: tpu_custom_call.1
= control target key start
LH: loop header
LB: loop body
LE: loop exit
PB: predicated region body
PF: predicated region fallthrough
CT: control target
= control target key end

     0   :  { %19 = vsyncpa [#allocation3], 0  ;;  %s1537_s0 = inlined_call_operand.vmem [shape: f32[2,16,16], index: 0, kind: input, shape index: {}]   ;;  %s1538_s1 = inlined_call_operand.vmem [shape: f32[2,16,16], index: 1, kind: input, shape index: {}]   ;;  %s1539_s2 = inlined_call_operand.vmem [shape: f32[2,16,16], index: 2, kind: input, shape index: {}]   ;;  %s1540_s3 = inlined_call_operand.hbm [shape: f32[16,16], index: 3, kind: input, shape index: {}]   ;;  %s1541_s4 = inlined_call_operand.vmem [shape: f32[16,8], index: 4, kind: input, shape index: {}]   ;;  %s1542_s5 = inlined_call_operand.vmem [shape: f32[8,32], index: 5, kind: input, shape index: {}]   ;;  %s1543_s6 = inlined_call_operand.hbm [shape: f32[8,32], index: 6, kind: input, shape index: {}]   ;;  %s1544_s7 = inlined_call_operand.vmem [shape: f32[1,32], index: 7, kind: input, shape index: {}]   ;;  %s1545_s8 = inlined_call_operand.vmem [shape: f32[32,4], index: 8, kind: input, shape index: {}]   ;;  %s1546_s9 = inlined_call_operand.vmem [shape: f32[32,4], index: 9, kind: input, shape index: {}]   ;;  %s1547_s10 = inlined_call_operand.vmem [shape: f32[1,4], index: 10, kind: input, shape index: {}]   ;;  %s1548_s11 = inlined_call_operand.vmem [shape: f32[16,4], index: 11, kind: input, shape index: {}]   ;;  %s1549_s12 = inlined_call_operand.vmem [shape: f32[2,1,1], index: 12, kind: output, shape index: {0}]   ;;  %s1550_s13 = inlined_call_operand.vmem [shape: f32[2,1,1], index: 13, kind: output, shape index: {1}]  }
   0x1   :  { %20 = vsyncpa [#allocation5], 0  ;;  %s1348_s25 = smov 0  }
   0x2 LB: > { %s361_s28 = sshll.u32 %s1540_s3, 4  ;;  %s1097_s29 = sadd.s32 4294967295, %s1270_s25   ;;  %s1270_s25 = sphi %s1348_s25, %s26_s25   ;;  %s362_s28 = int_to_ptr.hbm [resolvable:$true] %s361_s28 }
   0x3   : > { %p1099_p0 = scmp.ge.s32.totalorder %s1270_s25, 1  ;;  %p350_p1 = scmp.lt.s32.totalorder %s1270_s25, 3 }
   0x4   : > { %p1154_p2 = scmp.eq.s32.totalorder %s1097_s29, 0  ;;  %s1272_s14 = smov [#allocation2]  }
   0x5   : > { %p1359_p3 = pnand %p1099_p0, %p350_p1  ;;  %s363_s15 = sshll.u32 %s1272_s14, 4  ;;  %s364_s15 = int_to_ptr.vmem [resolvable:$true] %s363_s15 }
   0x6   : > { %s382_s18 = sshll.u32 %s1543_s6, 4  ;;  %s1273_s19 = smov [#allocation4]   ;;  %s383_s18 = int_to_ptr.hbm [resolvable:$true] %s382_s18 }
   0x7   : > { %p1147_p4 = pneg %p1359_p3  ;;  %s384_s20 = sshll.u32 %s1273_s19, 4  ;;  %s385_s20 = int_to_ptr.vmem [resolvable:$true] %s384_s20 }
   0x8   : > { %s1274_s21 = smov 128   ;;  %s1275_s22 = smov 8  }
   0x9   : > { %p1148_p5 = pnand %p1154_p2, %p1147_p4  ;;  %436 = sbr.rel (%p1359_p3) target bundleno = 1375 (0x55f), region = 68 }
   0xb   : > { %1150 = dma.hbm_to_vmem [thread:$0]  (!%p1148_p5), %s362_s28, 256, %s364_s15, [#allocation3], %s1274_s21, %s1274_s21, %s1275_s22  }
   0xc   : > { %1153 = dma.hbm_to_vmem [thread:$0]  (!%p1148_p5), %s383_s18, 128, %s385_s20, [#allocation5]  }
   0xe   : > { %1261 = dma.done.wait (%p1154_p2), [#allocation3], 256  }
   0xf   : > { %1263 = vsyncadd (%p1154_p2), [#allocation3], 4294967040 }
  0x10   : > { %1265 = dma.done.wait (%p1154_p2), [#allocation5], 128  }
  0x11   : > { %1267 = vsyncadd (%p1154_p2), [#allocation5], 4294967168  ;;  %p497_p6 = scmp.lt.s32.totalorder %s1097_s29, 1  ;;  %vm524_vm0 = vcmask 130048   ;;  %v555_v30 = vlaneseq }
  0x13   : > { %s1553_s29 = smov (!%p497_p6, %s1097_s29), 1  ;;  %v556_v34 = vshrl.u32 %v555_v30, 7 }
  0x14   : > { %s1378_s23 = sshll.u32 %s1553_s29, 4  ;;  %s517_s20 = scalar_lea.vmem %s1550_s13, %s1553_s29 }
  0x15   : > { %s506_s27 = scalar_lea.vmem %s1538_s1, %s1378_s23  ;;  %s511_s14 = scalar_lea.vmem %s1539_s2, %s1378_s23  ;;  %v557_v37 = vadd.s32 8, %v556_v34  ;;  %v1396_v40 = vcvt.s32.f32 %v556_v34 }
  0x16   : > { %v520_v0 = vld [vmem:[%s506_s27] sm:$0xff]  ;;  %v521_v2 = vld [vmem:[%s506_s27 + $0x8] sm:$0xff]  ;;  %s501_s17 = scalar_lea.vmem %s1537_s0, %s1378_s23  ;;  %s514_s23 = scalar_lea.vmem %s1549_s12, %s1553_s29 }
  0x17   : > { %v525_v1 = vsel %vm524_vm0, %v520_v0, -inf  ;;  %v528_v3 = vsel %vm524_vm0, %v521_v2, -inf  ;;  %v551_v22 = vld [vmem:[%s511_s14] sm:$0xff]  ;;  %v552_v24 = vld [vmem:[%s511_s14 + $0x8] sm:$0xff]  ;;  %v1398_v41 = vcvt.s32.f32 %v557_v37 }
  0x18   : > { %526 = vmax.xlane.f32.xlu0 %v525_v1 }
  0x20   : > { %529 = vmax.xlane.f32.xlu0 %v528_v3 }
  0x8b   : > { %v527_v4 = vpop.xlane.xlu0 %526 }
  0x8c   : > { %v531_v5 = vsub.f32 %v520_v0, %v527_v4 }
  0x8e   : > { %v533_v6 = vmul.f32 1.442695, %v531_v5 }
  0x90   : > { %1174 = vpow2.f32 %v533_v6 }
  0x93   : > { %v530_v7 = vpop.xlane.xlu0 %529 }
  0x94   : > { %v532_v8 = vsub.f32 %v521_v2, %v530_v7 }
  0x96   : > { %v1175_v9 = vpop.eup %1174  ;;  %v535_v10 = vmul.f32 1.442695, %v532_v8 }
  0x97   : > { %v537_v11 = vsel %vm524_vm0, %v1175_v9, 0.0 }
  0x98   : > { %1176 = vpow2.f32 %v535_v10  ;;  %538 = vadd.xlane.f32.xlu1 %v537_v11 }
  0x9e   : > { %v1177_v12 = vpop.eup %1176 }
  0x9f   : > { %v540_v13 = vsel %vm524_vm0, %v1177_v12, 0.0  ;;  %v1276_v12 = vmov 0.0  }
  0xa0   : > { %541 = vadd.xlane.f32.xlu1 %v540_v13 }
 0x10b   : > { %v539_v14 = vpop.xlane.xlu1 %538 }
 0x10c   : > { %1178 = vlog2.f32 %v539_v14 }
 0x112   : > { %v1179_v15 = vpop.eup %1178 }
 0x113   : > { %v544_v16 = vmul.f32 0.6931472, %v1179_v15  ;;  %v542_v17 = vpop.xlane.xlu1 %541 }
 0x114   : > { %1180 = vlog2.f32 %v542_v17 }
 0x115   : > { %v547_v18 = vadd.f32 %v544_v16, %v527_v4 }
 0x117   : > { %v549_v20 = vsub.f32 %v520_v0, %v547_v18 }
 0x119   : > { %v553_v25 = vadd.f32 %v551_v22, %v549_v20 }
 0x11a   : > { %v1181_v19 = vpop.eup %1180 }
 0x11b   : > { %v546_v21 = vmul.f32 0.6931472, %v1181_v19  ;;  %v560_v29 = vsel %vm524_vm0, %v553_v25, -inf }
 0x11d   : > { %v548_v23 = vadd.f32 %v546_v21, %v530_v7 }
 0x11f   : > { %v550_v26 = vsub.f32 %v521_v2, %v548_v23  ;;  %v1392_v27 = vadd.f32 %v548_v23, %v547_v18 }
 0x121   : > { %v554_v28 = vadd.f32 %v552_v24, %v550_v26 }
 0x123   : > { %v561_v31 = vsel %vm524_vm0, %v554_v28, -inf }
 0x124   : > { %v562_v32 = vmax.f32 %v560_v29, %v561_v31 }
 0x126   : > { %v563_v33 = vrot.slane %v562_v32, 4 }
 0x128   : > { %v564_v35 = vmax.f32 %v562_v32, %v563_v33 }
 0x12a   : > { %v565_v36 = vrot.slane %v564_v35, 2 }
 0x12c   : > { %v566_v38 = vmax.f32 %v564_v35, %v565_v36 }
 0x12e   : > { %v567_v39 = vrot.slane %v566_v38, 1 }
 0x130   : > { %v568_v42 = vmax.f32 %v566_v38, %v567_v39 }
 0x132   : > { %vm569_vm1 = vcmp.ge.f32.partialorder %v553_v25, %v568_v42  ;;  %vm570_vm2 = vcmp.ge.f32.partialorder %v554_v28, %v568_v42 }
 0x133   : > { %v571_v43 = vsel %vm569_vm1, %v1396_v40, 16.0  ;;  %v572_v44 = vsel %vm570_vm2, %v1398_v41, 16.0  ;;  %vm763_vm2 = vcmask 64512  }
 0x134   : > { %v573_v45 = vsel %vm524_vm0, %v571_v43, inf  ;;  %v574_v46 = vsel %vm524_vm0, %v572_v44, inf }
 0x135   : > { %v575_v47 = vmin.f32 %v573_v45, %v574_v46 }
 0x137   : > { %v576_v48 = vrot.slane %v575_v47, 4 }
 0x139   : > { %v577_v49 = vmin.f32 %v575_v47, %v576_v48 }
 0x13b   : > { %v578_v50 = vrot.slane %v577_v49, 2 }
 0x13d   : > { %v579_v51 = vmin.f32 %v577_v49, %v578_v50 }
 0x13f   : > { %v580_v52 = vrot.slane %v579_v51, 1 }
 0x141   : > { %v581_v53 = vmin.f32 %v579_v51, %v580_v52 }
 0x143   : > { %vm583_vm3 = vcmp.eq.f32.partialorder %v1398_v41, %v581_v53  ;;  %vm582_vm4 = vcmp.eq.f32.partialorder %v1396_v40, %v581_v53 }
 0x144   : > { %v591_v54 = vsel %vm583_vm3, -1e+30, %v554_v28  ;;  %v590_v55 = vsel %vm582_vm4, -1e+30, %v553_v25  ;;  %v1112_v13 = vsel %vm582_vm4, 1.0, %v1276_v12  ;;  %v1113_v14 = vsel %vm583_vm3, 1.0, %v1276_v12 }
 0x145   : > { %v593_v56 = vsel %vm524_vm0, %v591_v54, -inf  ;;  %v592_v57 = vsel %vm524_vm0, %v590_v55, -inf  ;;  %vm861_vm3 = vcmask 261120   ;;  %vm928_vm4 = vcmask 31744  }
 0x146   : > { %v594_v58 = vmax.f32 %v592_v57, %v593_v56 }
 0x148   : > { %v595_v59 = vrot.slane %v594_v58, 4 }
 0x14a   : > { %v596_v60 = vmax.f32 %v594_v58, %v595_v59 }
 0x14c   : > { %v597_v61 = vrot.slane %v596_v60, 2 }
 0x14e   : > { %v598_v62 = vmax.f32 %v596_v60, %v597_v61 }
 0x150   : > { %v599_v63 = vrot.slane %v598_v62, 1 }
 0x152   : > { %v600_v0 = vmax.f32 %v598_v62, %v599_v63 }
 0x154   : > { %vm601_vm5 = vcmp.ge.f32.partialorder %v590_v55, %v600_v0  ;;  %vm602_vm6 = vcmp.ge.f32.partialorder %v591_v54, %v600_v0 }
 0x155   : > { %v603_v1 = vsel %vm601_vm5, %v1396_v40, 16.0  ;;  %v604_v2 = vsel %vm602_vm6, %v1398_v41, 16.0 }
 0x156   : > { %v605_v3 = vsel %vm524_vm0, %v603_v1, inf  ;;  %v606_v4 = vsel %vm524_vm0, %v604_v2, inf }
 0x157   : > { %v607_v5 = vmin.f32 %v605_v3, %v606_v4  ;;  %v522_v3 = vld [vmem:[#allocation2] sm:$0xff] }
 0x159   : > { %v608_v6 = vrot.slane %v607_v5, 4 }
 0x15b   : > { %v609_v7 = vmin.f32 %v607_v5, %v608_v6  ;;  %v710_v6 = vmul.f32 2.0, %v522_v3 }
 0x15d   : > { %v610_v8 = vrot.slane %v609_v7, 2 }
 0x15f   : > { %v611_v9 = vmin.f32 %v609_v7, %v610_v8  ;;  %v523_v7 = vld [vmem:[#allocation2 + $0x8] sm:$0xff] }
 0x161   : > { %v612_v10 = vrot.slane %v611_v9, 1 }
 0x163   : > { %v613_v11 = vmin.f32 %v611_v9, %v612_v10  ;;  %v712_v9 = vsub.f32 1.0, %v710_v6  ;;  %v711_v10 = vmul.f32 2.0, %v523_v7 }
 0x165   : > { %vm614_vm7 = vcmp.eq.f32.partialorder %v1396_v40, %v613_v11  ;;  %vm615_vm8 = vcmp.eq.f32.partialorder %v1398_v41, %v613_v11  ;;  %v518_v11 = vld [vmem:[%s501_s17] sm:$0xff] }
 0x166   : > { %v1114_v15 = vsel %vm614_vm7, 1.0, %v1276_v12  ;;  %v622_v16 = vsel %vm614_vm7, -1e+30, %v590_v55  ;;  %v623_v17 = vsel %vm615_vm8, -1e+30, %v591_v54  ;;  %v1115_v18 = vsel %vm615_vm8, 1.0, %v1276_v12 }
 0x167   : > { %v620_v19 = vadd.f32 %v1114_v15, %v1112_v13  ;;  %v624_v20 = vsel %vm524_vm0, %v622_v16, -inf  ;;  %v625_v21 = vsel %vm524_vm0, %v623_v17, -inf  ;;  %v621_v22 = vadd.f32 %v1115_v18, %v1113_v14  ;;  %v519_v13 = vld [vmem:[%s501_s17 + $0x8] sm:$0xff] }
 0x168   : > { %v626_v23 = vmax.f32 %v624_v20, %v625_v21  ;;  %v713_v20 = vsub.f32 1.0, %v711_v10 }
 0x16a   : > { %v627_v24 = vrot.slane %v626_v23, 4 }
 0x16c   : > { %v628_v25 = vmax.f32 %v626_v23, %v627_v24 }
 0x16e   : > { %v629_v26 = vrot.slane %v628_v25, 2 }
 0x170   : > { %v630_v28 = vmax.f32 %v628_v25, %v629_v26 }
 0x172   : > { %v631_v29 = vrot.slane %v630_v28, 1 }
 0x174   : > { %v632_v30 = vmax.f32 %v630_v28, %v631_v29  ;;  %v731_v28 = vld [vmem:[%s1541_s4 + $0x8] sm:$0xff]  ;;  %v730_v29 = vld [vmem:[%s1541_s4] sm:$0xff] }
 0x175   : > { %752 = vmatpush.msra.mxu0 %v731_v28 }
 0x176   : > { %vm633_vm9 = vcmp.ge.f32.partialorder %v622_v16, %v632_v30  ;;  %vm634_vm10 = vcmp.ge.f32.partialorder %v623_v17, %v632_v30  ;;  %v761_v30 = vld [vmem:[%s1542_s5] sm:$0xff] }
 0x177   : > { %v635_v31 = vsel %vm633_vm9, %v1396_v40, 16.0  ;;  %v636_v32 = vsel %vm634_vm10, %v1398_v41, 16.0  ;;  %753 = vmatpush.msra.mxu0 %v730_v29  ;;  %814 = vmatpush.msra.mxu2 %v761_v30 }
 0x178   : > { %v637_v33 = vsel %vm524_vm0, %v635_v31, inf  ;;  %v638_v34 = vsel %vm524_vm0, %v636_v32, inf  ;;  %1138 = vmatpush.msra.mxu3 %v761_v30  ;;  %1124 = vmatmul.msk.f32.vlgmr.msra.gmra.mxu2 %vm763_vm2, %v730_v29 }
 0x179   : > { %v639_v35 = vmin.f32 %v637_v33, %v638_v34  ;;  %1125 = vmatmul.msk.f32.vlgmr.msra.gmra.mxu3 %vm763_vm2, %v731_v28 }
 0x17b   : > { %v640_v36 = vrot.slane %v639_v35, 4 }
 0x17d   : > { %v641_v37 = vmin.f32 %v639_v35, %v640_v36 }
 0x17f   : > { %v642_v38 = vrot.slane %v641_v37, 2 }
 0x181   : > { %v643_v39 = vmin.f32 %v641_v37, %v642_v38 }
 0x183   : > { %v644_v42 = vrot.slane %v643_v39, 1 }
 0x185   : > { %v645_v43 = vmin.f32 %v643_v39, %v644_v42  ;;  %v762_v39 = vld [vmem:[#allocation4] sm:$0xff] }
 0x186   : > { %785 = vmatpush.msrb.mxu0 %v762_v39  ;;  %1137 = vmatpush.msra.mxu1 %v762_v39  ;;  %v1277_v39 = vmov 16.0  }
 0x187   : > { %vm646_vm11 = vcmp.eq.f32.partialorder %v1396_v40, %v645_v43  ;;  %vm647_vm12 = vcmp.eq.f32.partialorder %v1398_v41, %v645_v43 }
 0x188   : > { %v1116_v44 = vsel %vm646_vm11, 1.0, %v1276_v12  ;;  %v654_v45 = vsel %vm646_vm11, -1e+30, %v622_v16  ;;  %v655_v46 = vsel %vm647_vm12, -1e+30, %v623_v17  ;;  %v1117_v51 = vsel %vm647_vm12, 1.0, %v1276_v12 }
 0x189   : > { %v652_v47 = vadd.f32 %v1116_v44, %v620_v19  ;;  %v656_v48 = vsel %vm524_vm0, %v654_v45, -inf  ;;  %v657_v49 = vsel %vm524_vm0, %v655_v46, -inf  ;;  %v653_v52 = vadd.f32 %v1117_v51, %v621_v22  ;;  %v856_v44 = vld [vmem:[%s1545_s8 + $0x18] sm:$0xff] }
 0x18a   : > { %v658_v50 = vmax.f32 %v656_v48, %v657_v49  ;;  %909 = vmatpush.msrb.mxu2 %v856_v44  ;;  %v1172_v49 = vld [vmem:[%s1544_s7] ss:$0 sm:$0xff] }
 0x18c   : > { %v659_v53 = vrot.slane %v658_v50, 4 }
 0x18e   : > { %v660_v54 = vmax.f32 %v658_v50, %v659_v53 }
 0x190   : > { %v661_v55 = vrot.slane %v660_v54, 2 }
 0x192   : > { %v662_v56 = vmax.f32 %v660_v54, %v661_v55 }
 0x194   : > { %v663_v57 = vrot.slane %v662_v56, 1 }
 0x196   : > { %v664_v58 = vmax.f32 %v662_v56, %v663_v57 }
 0x198   : > { %vm665_vm13 = vcmp.ge.f32.partialorder %v654_v45, %v664_v58  ;;  %vm666_vm14 = vcmp.ge.f32.partialorder %v655_v46, %v664_v58  ;;  %v855_v45 = vld [vmem:[%s1545_s8 + $0x10] sm:$0xff]  ;;  %v854_v46 = vld [vmem:[%s1545_s8 + $0x8] sm:$0xff] }
 0x199   : > { %v667_v59 = vsel %vm665_vm13, %v1396_v40, 16.0  ;;  %v668_v60 = vsel %vm666_vm14, %v1398_v41, 16.0  ;;  %910 = vmatpush.msrb.mxu2 %v855_v45 }
 0x19a   : > { %v669_v61 = vsel %vm524_vm0, %v667_v59, inf  ;;  %v670_v62 = vsel %vm524_vm0, %v668_v60, inf  ;;  %v860_v59 = vld [vmem:[%s1546_s9 + $0x18] sm:$0xff]  ;;  %v859_v60 = vld [vmem:[%s1546_s9 + $0x10] sm:$0xff] }
 0x19b   : > { %v671_v63 = vmin.f32 %v669_v61, %v670_v62  ;;  %911 = vmatpush.msrb.mxu2 %v854_v46  ;;  %880 = vmatpush.msrb.mxu1 %v860_v59  ;;  %v858_v61 = vld [vmem:[%s1546_s9 + $0x8] sm:$0xff]  ;;  %v857_v62 = vld [vmem:[%s1546_s9] sm:$0xff] }
 0x19d   : > { %v672_v0 = vrot.slane %v671_v63, 4  ;;  %881 = vmatpush.msrb.mxu1 %v859_v60 }
 0x19f   : > { %v673_v1 = vmin.f32 %v671_v63, %v672_v0  ;;  %882 = vmatpush.msrb.mxu1 %v858_v61 }
 0x1a1   : > { %v674_v2 = vrot.slane %v673_v1, 2  ;;  %883 = vmatpush.msrb.mxu1 %v857_v62 }
 0x1a3   : > { %v675_v4 = vmin.f32 %v673_v1, %v674_v2  ;;  %v1173_v2 = vld [vmem:[%s1547_s10] ss:$0 sm:$0xff] }
 0x1a5   : > { %v676_v5 = vrot.slane %v675_v4, 1 }
 0x1a7   : > { %v677_v8 = vmin.f32 %v675_v4, %v676_v5 }
 0x1a9   : > { %vm678_vm15 = vcmp.eq.f32.partialorder %v1396_v40, %v677_v8  ;;  %vm679_vm1 = vcmp.eq.f32.partialorder %v1398_v41, %v677_v8 }
 0x1aa   : > { %v1118_v14 = vsel %vm678_vm15, 1.0, %v1276_v12  ;;  %v1119_v15 = vsel %vm679_vm1, 1.0, %v1276_v12 }
 0x1ab   : > { %v684_v16 = vadd.f32 %v1118_v14, %v652_v47  ;;  %v685_v17 = vadd.f32 %v1119_v15, %v653_v52  ;;  %v853_v47 = vld [vmem:[%s1545_s8] sm:$0xff] }
 0x1ac   : > { %912 = vmatpush.msrb.mxu2 %v853_v47 }
 0x1ad   : > { %v714_v18 = vmul.f32 %v712_v9, %v684_v16  ;;  %v686_v19 = vmul.f32 %v684_v16, %v518_v11  ;;  %v687_v21 = vmul.f32 %v685_v17, %v519_v13  ;;  %v715_v25 = vmul.f32 %v713_v20, %v685_v17  ;;  %v926_v13 = vld [vmem:[%s1548_s11] sm:$0xff] }
 0x1af   : > { %v716_v22 = vadd.f32 %v714_v18, %v522_v3  ;;  %v688_v23 = vsel %vm524_vm0, %v686_v19, 0.0  ;;  %v689_v40 = vsel %vm524_vm0, %v687_v21, 0.0  ;;  %v717_v26 = vadd.f32 %v715_v25, %v523_v7 }
 0x1b0   : > { %v1452_v24 = vadd.f32 %v689_v40, %v688_v23 }
 0x1b1   : > { %v718_v41 = vsel %vm524_vm0, %v716_v22, 0.0  ;;  %v721_v12 = vsel %vm524_vm0, %v717_v26, 0.0 }
 0x1b2   : > { %719 = vadd.xlane.f32.xlu2 %v718_v41  ;;  %v691_v19 = vrot.slane %v1452_v24, 4 }
 0x1b4   : > { %v692_v21 = vadd.f32 %v691_v19, %v1452_v24 }
 0x1b6   : > { %v693_v25 = vrot.slane %v692_v21, 2 }
 0x1b8   : > { %v694_v28 = vadd.f32 %v693_v25, %v692_v21 }
 0x1ba   : > { %722 = vadd.xlane.f32.xlu2 %v721_v12  ;;  %v695_v24 = vrot.slane %v694_v28, 1 }
 0x1fb   : > { %v816_v48 = vpop.f32.mrf.mxu2 }
 0x1fc   : > { %v819_v54 = vpop.f32.mrf.mxu3 }
 0x225   : > { %v720_v31 = vpop.xlane.xlu2 %719 }
 0x226   : > { %v724_v32 = vmax.f32 %v720_v31, 1.0 }
 0x228   : > { %1182 = vrcp.f32 %v724_v32  ;;  %v696_v32 = vadd.f32 %v695_v24, %v694_v28 }
 0x22d   : > { %v723_v33 = vpop.xlane.xlu2 %722 }
 0x22e   : > { %v1183_v34 = vpop.eup %1182  ;;  %v725_v35 = vmax.f32 %v723_v33, 1.0  ;;  %v697_v33 = vsel %vm524_vm0, %v696_v32, 0.0 }
 0x22f   : > { %v728_v36 = vmul.f32 %v1183_v34, %v716_v22  ;;  %v701_v34 = vrot.slane %v1392_v27, 4 }
 0x230   : > { %1184 = vrcp.f32 %v725_v35 }
 0x231   : > { %1120 = vmatmul.msk.f32.vlgmr.msra.gmra.mxu0 %vm524_vm0, %v728_v36  ;;  %v702_v35 = vadd.f32 %v701_v34, %v1392_v27 }
 0x236   : > { %v1185_v37 = vpop.eup %1184 }
 0x237   : > { %v729_v38 = vmul.f32 %v1185_v37, %v717_v26  ;;  %v927_v26 = vld [vmem:[%s1548_s11 + $0x8] sm:$0xff]  ;;  %v703_v37 = vrot.slane %v702_v35, 2 }
 0x239   : > { %1121 = vmatmul.msk.f32.gmra.mxu0 %vm524_vm0, %v729_v38 }
 0x2ae   : > { %v755_v42 = vpop.f32.mrf.mxu0 }
 0x2af   : > { %1122 = vmatmul.msk.f32.vlgmr.msrb.gmra.mxu0 %vm763_vm2, %v755_v42 }
 0x2b6   : > { %v758_v43 = vpop.f32.mrf.mxu0 }
 0x2b7   : > { %1123 = vmatmul.msk.f32.vlgmr.msra.gmra.mxu1 %vm763_vm2, %v758_v43 }
 0x32c   : > { %v787_v50 = vpop.f32.mrf.mxu0 }
 0x32d   : > { %v817_v51 = vadd.f32 %v816_v48, %v787_v50 }
 0x32f   : > { %v826_v52 = vadd.f32 %v1172_v49, %v817_v51 }
 0x331   : > { %v828_v53 = vmax.f32 %v826_v52, 0.0 }
 0x333   : > { %1130 = vmatmul.msk.f32.vlgmr.msrb.gmra.mxu2 %vm861_vm3, %v828_v53 }
 0x334   : > { %v790_v55 = vpop.f32.mrf.mxu1 }
 0x335   : > { %v820_v56 = vadd.f32 %v819_v54, %v790_v55 }
 0x337   : > { %v827_v57 = vadd.f32 %v1172_v49, %v820_v56 }
 0x339   : > { %v829_v58 = vmax.f32 %v827_v57, 0.0 }
 0x33b   : > { %844 = vmatpush.msrb.mxu3 %v829_v58  ;;  %1131 = vmatmul.msk.f32.gmra.mxu2 %vm861_vm3, %v829_v58 }
 0x33d   : > { %845 = vmatpush.msrb.mxu3 %v828_v53 }
 0x33e   : > { %1126 = vmatmul.msk.f32.vlgmr.msrb.gmra.mxu3 %vm524_vm0, %v728_v36 }
 0x346   : > { %1127 = vmatmul.msk.f32.gmra.mxu3 %vm524_vm0, %v729_v38  ;;  %v704_v38 = vadd.f32 %v703_v37, %v702_v35  ;;  %vm708_vm0 = vcmask 0  }
 0x348   : > { %v705_v44 = vrot.slane %v704_v38, 1 }
 0x34a   : > { %v706_v48 = vadd.f32 %v705_v44, %v704_v38 }
 0x3b6   : > { %v914_v1 = vpop.f32.mrf.mxu2 }
 0x3be   : > { %v917_v7 = vpop.f32.mrf.mxu2 }
 0x3c1   : > { %v847_v63 = vpop.f32.mrf.mxu3 }
 0x3c2   : > { %1128 = vmatmul.msk.f32.vlgmr.msrb.gmra.mxu1 %vm861_vm3, %v847_v63 }
 0x3c9   : > { %v850_v0 = vpop.f32.mrf.mxu3 }
 0x3ca   : > { %1129 = vmatmul.msk.f32.gmra.mxu1 %vm861_vm3, %v850_v0 }
 0x43f   : > { %v885_v3 = vpop.f32.mrf.mxu1 }
 0x440   : > { %v915_v4 = vadd.f32 %v914_v1, %v885_v3 }
 0x442   : > { %v924_v5 = vadd.f32 %v1173_v2, %v915_v4 }
 0x444   : > { %v929_v6 = vsel %vm928_vm4, %v924_v5, -inf  ;;  %v953_v14 = vmul.f32 %v926_v13, %v924_v5 }
 0x445   : > { %930 = vmax.xlane.f32.xlu0 %v929_v6 }
 0x446   : > { %v955_v15 = vsel %vm928_vm4, %v953_v14, 0.0 }
 0x447   : > { %v888_v8 = vpop.f32.mrf.mxu1 }
 0x448   : > { %v918_v9 = vadd.f32 %v917_v7, %v888_v8 }
 0x44a   : > { %v925_v10 = vadd.f32 %v1173_v2, %v918_v9 }
 0x44c   : > { %v932_v11 = vsel %vm928_vm4, %v925_v10, -inf  ;;  %v954_v12 = vmul.f32 %v927_v26, %v925_v10 }
 0x44d   : > { %933 = vmax.xlane.f32.xlu1 %v932_v11 }
 0x44e   : > { %v958_v30 = vsel %vm928_vm4, %v954_v12, 0.0 }
 0x455   : > { %956 = vadd.xlane.f32.xlu1 %v955_v15 }
 0x4b8   : > { %v931_v16 = vpop.xlane.xlu0 %930 }
 0x4b9   : > { %v935_v17 = vsub.f32 %v924_v5, %v931_v16 }
 0x4bb   : > { %v937_v18 = vmul.f32 1.442695, %v935_v17 }
 0x4bd   : > { %1186 = vpow2.f32 %v937_v18 }
 0x4c0   : > { %v934_v20 = vpop.xlane.xlu1 %933 }
 0x4c1   : > { %v936_v22 = vsub.f32 %v925_v10, %v934_v20 }
 0x4c3   : > { %v1187_v23 = vpop.eup %1186  ;;  %v939_v40 = vmul.f32 1.442695, %v936_v22 }
 0x4c4   : > { %v941_v41 = vsel %vm928_vm4, %v1187_v23, 0.0 }
 0x4c5   : > { %1188 = vpow2.f32 %v939_v40  ;;  %942 = vadd.xlane.f32.xlu2 %v941_v41 }
 0x4c8   : > { %v957_v54 = vpop.xlane.xlu1 %956 }
 0x4cb   : > { %v1189_v29 = vpop.eup %1188 }
 0x4cc   : > { %v944_v31 = vsel %vm928_vm4, %v1189_v29, 0.0 }
 0x4cd   : > { %959 = vadd.xlane.f32.xlu2 %v958_v30  ;;  %945 = vadd.xlane.f32.xlu0 %v944_v31 }
 0x4d5   : > { %698 = vadd.xlane.f32.xlu0 %v697_v33 }
 0x538   : > { %v943_v36 = vpop.xlane.xlu2 %942 }
 0x539   : > { %1190 = vlog2.f32 %v943_v36 }
 0x53a   : > { %1192 = vrcp.f32 %v1277_v39 }
 0x53f   : > { %v1191_v43 = vpop.eup %1190 }
 0x540   : > { %v946_v42 = vpop.xlane.xlu0 %945  ;;  %v948_v45 = vmul.f32 0.6931472, %v1191_v43  ;;  %v1193_v46 = vpop.eup %1192 }
 0x541   : > { %1194 = vlog2.f32 %v946_v42  ;;  %v971_v51 = vmul.f32 16.0, %v1193_v46  ;;  %v960_v55 = vpop.xlane.xlu2 %959  ;;  %vm975_vm5 = vweird.f32 %v1193_v46 }
 0x542   : > { %v951_v49 = vadd.f32 %v948_v45, %v931_v16 }
 0x543   : > { %v972_v58 = vsub.f32 1.0, %v971_v51 }
 0x544   : > { %v961_v56 = vsub.f32 %v951_v49, %v957_v54 }
 0x545   : > { %v973_v61 = vmul.f32 %v1193_v46, %v972_v58 }
 0x547   : > { %v1195_v47 = vpop.eup %1194  ;;  %v974_v0 = vadd.f32 %v1193_v46, %v973_v61 }
 0x548   : > { %v950_v50 = vmul.f32 0.6931472, %v1195_v47  ;;  %v699_v27 = vpop.xlane.xlu0 %698 }
 0x549   : > { %v707_v52 = vsub.f32 %v699_v27, %v706_v48  ;;  %v976_v3 = vsel %vm975_vm5, %v1193_v46, %v974_v0 }
 0x54a   : > { %v952_v53 = vadd.f32 %v950_v50, %v934_v20 }
 0x54b   : > { %709 = vst.msk [vmem:[%s517_s20] sm:$0x1] %vm708_vm0, %v707_v52 }
 0x54c   : > { %v962_v57 = vsub.f32 %v952_v53, %v960_v55 }
 0x54e   : > { %v963_v59 = vadd.f32 %v962_v57, %v961_v56 }
 0x550   : > { %v964_v60 = vrot.slane %v963_v59, 4 }
 0x552   : > { %v965_v62 = vadd.f32 %v964_v60, %v963_v59 }
 0x554   : > { %v966_v63 = vrot.slane %v965_v62, 2 }
 0x556   : > { %v967_v1 = vadd.f32 %v966_v63, %v965_v62 }
 0x558   : > { %v968_v2 = vrot.slane %v967_v1, 1 }
 0x55a   : > { %v969_v4 = vadd.f32 %v968_v2, %v967_v1 }
 0x55c   : > { %v977_v5 = vmul.f32 %v976_v3, %v969_v4 }
 0x55e   : > { %978 = vst.msk [vmem:[%s514_s23] sm:$0x1] %vm708_vm0, %v977_v5 }
 0x55f PF: > { %s26_s25 = sadd.s32 1, %s1270_s25  }
 0x560   : > { %p23_p7 = scmp.ge.s32.totalorder %s26_s25, 4  }
 0x562   :  { %25 = sbr.rel (!%p23_p7) target bundleno = 2 (0x2), region = 125 }
 0x567   :  { %1008 = vsyncpa [#allocation3], 1 }
 0x568   :  { %1010 = vsyncpa [#allocation3 + $0x1], 1 }
 0x569   :  { %1011 = vsyncpa [#allocation5], 1 }

</bundles_post_ra>
